<compile_context>
chip_gen: v5e
topology: v5e:2x2
jax: 0.10.0
libtpu: 0.0.40
codegen_flags: <defaults>
</compile_context>

<pallas_src>
import jax
import jax.numpy as jnp
from jax.experimental import pallas as pl
from jax.experimental.pallas import tpu as pltpu

HIDDEN = 64


def _mlp_kernel(x_ref, w1_ref, b1_ref, w2t_ref, b2_ref, w3_ref, b3_ref, o_ref):
    x = x_ref[...]                                            # (1, TB) f32
    # Layer 1: in_features == 1 -> outer product on the VPU.
    # (64,1) lane-broadcast * (1,TB) sublane-replicate -> (64, TB)
    h = jnp.maximum(w1_ref[...] * x + b1_ref[...], 0.0)      # (64, TB)
    # Layer 2: (64,64) @ (64,TB) on the MXU, f32 accumulation, TB-wide result.
    h = jnp.dot(w2t_ref[...], h, preferred_element_type=jnp.float32) + b2_ref[...]
    h = jnp.maximum(h, 0.0)                                   # (64, TB)
    # Layer 3: (1,64) @ (64,TB) -> lane-dense (1, TB) result.
    y = jnp.dot(w3_ref[...], h, preferred_element_type=jnp.float32) + b3_ref[...]
    o_ref[...] = y.astype(o_ref.dtype)


def function_approximator(x, w1, b1, w2, b2, w3, b3, *, block_cols: int = 2048):
    """Fused forward pass of the 1->64->64->1 MLP.

    x: (N, 1).  Weights stored (in, out); biases 1-D (out,).  Equivalent to
    torch: l3(relu(l2(relu(l1(x))))) with l_k.weight == w_k.T, l_k.bias == b_k.
    """
    n = x.shape[0]
    dtype = x.dtype

    # Lane-dense presentation (metadata-only reshape): batch -> lane axis.
    x_row = x.reshape(1, n)

    # Weights in the transposed-activation layout, all tiny and VMEM-resident.
    w1c = w1.reshape(HIDDEN, 1)          # (64, 1)
    b1c = b1.reshape(HIDDEN, 1)          # (64, 1)
    w2t = w2.T                           # (64, 64)  (out, in)
    b2c = b2.reshape(HIDDEN, 1)          # (64, 1)
    w3r = w3.reshape(1, HIDDEN)          # (1, 64)   == w3.T
    b3r = b3.reshape(1, 1)               # (1, 1)

    if n <= block_cols:
        # Single block equal to the full array (no (8,128) constraint, no pad).
        tb = n
    else:
        # Tile the lane axis: multiple of 128, >= 2 grid steps, <= block_cols.
        tb = min(block_cols, pl.cdiv(pl.cdiv(n, 2), 128) * 128)
        tb = max(tb, 128)
    grid = (pl.cdiv(n, tb),)

    def resident(shape):
        # Same (only) block every grid step -> weights stay in VMEM.
        return pl.BlockSpec(shape, lambda i: (0, 0))

    cost = pl.CostEstimate(
        flops=2 * n * HIDDEN * (HIDDEN + 2),
        transcendentals=0,
        bytes_accessed=8 * n + 4 * (2 * HIDDEN + HIDDEN * HIDDEN + HIDDEN + HIDDEN + 1),
    )

    out = pl.pallas_call(
        _mlp_kernel,
        out_shape=jax.ShapeDtypeStruct((1, n), dtype),
        grid_spec=pltpu.PrefetchScalarGridSpec(
            num_scalar_prefetch=0,
            grid=grid,
            in_specs=[
                pl.BlockSpec((1, tb), lambda i: (0, i)),   # x batch tile (lane-dense)
                resident((HIDDEN, 1)),                     # w1 column
                resident((HIDDEN, 1)),                     # b1 column
                resident((HIDDEN, HIDDEN)),                # w2^T
                resident((HIDDEN, 1)),                     # b2 column
                resident((1, HIDDEN)),                     # w3 row
                resident((1, 1)),                          # b3
            ],
            out_specs=pl.BlockSpec((1, tb), lambda i: (0, i)),
        ),
        compiler_params=pltpu.CompilerParams(
            dimension_semantics=("parallel",),             # megacore-shardable on v7x
        ),
        cost_estimate=cost,
    )(x_row, w1c, b1c, w2t, b2c, w3r, b3r)

    return out.reshape(n, 1)


def _mlp_ref(x, w1, b1, w2, b2, w3, b3):
    h = jnp.maximum(x @ w1 + b1.reshape(1, -1), 0.0)
    h = jnp.maximum(h @ w2 + b2.reshape(1, -1), 0.0)
    return h @ w3 + b3.reshape(1, -1)


if __name__ == "__main__":
    key = jax.random.PRNGKey(0)
    kx, k1, kb1, k2, kb2, k3, kb3 = jax.random.split(key, 7)

    n = 256
    x = jax.random.normal(kx, (n, 1), dtype=jnp.float32)

    # PyTorch-Linear-like uniform(-1/sqrt(fan_in), 1/sqrt(fan_in)) init, stored (in, out).
    w1 = jax.random.uniform(k1, (1, HIDDEN), jnp.float32, -1.0, 1.0)
    b1 = jax.random.uniform(kb1, (HIDDEN,), jnp.float32, -1.0, 1.0)
    w2 = jax.random.uniform(k2, (HIDDEN, HIDDEN), jnp.float32, -0.125, 0.125)
    b2 = jax.random.uniform(kb2, (HIDDEN,), jnp.float32, -0.125, 0.125)
    w3 = jax.random.uniform(k3, (HIDDEN, 1), jnp.float32, -0.125, 0.125)
    b3 = jax.random.uniform(kb3, (1,), jnp.float32, -0.125, 0.125)

    # Path 1: whole batch in one block (block == full array).
    y = jax.block_until_ready(function_approximator(x, w1, b1, w2, b2, w3, b3))

    # Path 2: force tiling (grid >= 2) + ragged last block to exercise Pallas
    # block clamping / masked stores (no host-side pad, no output slice).
    n2 = 250
    y2 = jax.block_until_ready(
        function_approximator(x[:n2], w1, b1, w2, b2, w3, b3, block_cols=128)
    )

    y_ref = _mlp_ref(x, w1, b1, w2, b2, w3, b3)
    assert y.shape == (n, 1) and y.dtype == x.dtype
    assert jnp.allclose(y, y_ref, atol=1e-5, rtol=1e-5)
    assert y2.shape == (n2, 1)
    assert jnp.allclose(y2, y_ref[:n2], atol=1e-5, rtol=1e-5)

    print("KERNEL_OK")
</pallas_src>

<mosaic_0001>
module attributes {stable_mosaic.version = 11 : i64} {
  func.func @_mlp_kernel(%arg0: i32, %arg1: memref<1x256xf32, #tpu.memory_space<vmem>>, %arg2: memref<64x1xf32, #tpu.memory_space<vmem>>, %arg3: memref<64x1xf32, #tpu.memory_space<vmem>>, %arg4: memref<64x64xf32, #tpu.memory_space<vmem>>, %arg5: memref<64x1xf32, #tpu.memory_space<vmem>>, %arg6: memref<1x64xf32, #tpu.memory_space<vmem>>, %arg7: memref<1x1xf32, #tpu.memory_space<vmem>>, %arg8: memref<1x256xf32, #tpu.memory_space<vmem>>) attributes {dimension_semantics = [#tpu.dimension_semantics<parallel>], iteration_bounds = array<i64: 1>, scalar_prefetch = 0 : i64, scratch_operands = 0 : i64, tpu.core_type = #tpu.core_type<tc>, window_params = [{transform_indices = @transform_0, window_bounds = array<i64: 1, 256>}, {pipeline_mode = #tpu.pipeline_mode<synchronous>, transform_indices = @transform_1, window_bounds = array<i64: 64, 1>}, {pipeline_mode = #tpu.pipeline_mode<synchronous>, transform_indices = @transform_2, window_bounds = array<i64: 64, 1>}, {pipeline_mode = #tpu.pipeline_mode<synchronous>, transform_indices = @transform_3, window_bounds = array<i64: 64, 64>}, {pipeline_mode = #tpu.pipeline_mode<synchronous>, transform_indices = @transform_4, window_bounds = array<i64: 64, 1>}, {pipeline_mode = #tpu.pipeline_mode<synchronous>, transform_indices = @transform_5, window_bounds = array<i64: 1, 64>}, {pipeline_mode = #tpu.pipeline_mode<synchronous>, transform_indices = @transform_6, window_bounds = array<i64: 1, 1>}, {transform_indices = @transform_7, window_bounds = array<i64: 1, 256>}]} {
    %c0 = arith.constant 0 : index
    %c0_0 = arith.constant 0 : index
    %0 = vector.load %arg1[%c0, %c0_0] : memref<1x256xf32, #tpu.memory_space<vmem>>, vector<1x256xf32>
    %c0_1 = arith.constant 0 : index
    %c0_2 = arith.constant 0 : index
    %1 = vector.load %arg2[%c0_1, %c0_2] : memref<64x1xf32, #tpu.memory_space<vmem>>, vector<64x1xf32>
    %2 = vector.broadcast %1 : vector<64x1xf32> to vector<64x256xf32>
    %3 = vector.broadcast %0 : vector<1x256xf32> to vector<64x256xf32>
    %4 = arith.mulf %2, %3 : vector<64x256xf32>
    %c0_3 = arith.constant 0 : index
    %c0_4 = arith.constant 0 : index
    %5 = vector.load %arg3[%c0_3, %c0_4] : memref<64x1xf32, #tpu.memory_space<vmem>>, vector<64x1xf32>
    %6 = vector.broadcast %5 : vector<64x1xf32> to vector<64x256xf32>
    %7 = arith.addf %4, %6 : vector<64x256xf32>
    %cst = arith.constant 0.000000e+00 : f32
    %8 = vector.broadcast %cst : f32 to vector<64x256xf32>
    %9 = arith.maximumf %7, %8 : vector<64x256xf32>
    %c0_5 = arith.constant 0 : index
    %c0_6 = arith.constant 0 : index
    %10 = vector.load %arg4[%c0_5, %c0_6] : memref<64x64xf32, #tpu.memory_space<vmem>>, vector<64x64xf32>
    %cst_7 = arith.constant dense<0.000000e+00> : vector<64x256xf32>
    %11 = tpu.matmul %10, %9, %cst_7 {dimension_numbers = #tpu.dot_dimension_numbers<[1], [0], [0], [1], [0, 0, 1, 1], [], []>} : vector<64x64xf32>, vector<64x256xf32>, vector<64x256xf32> -> vector<64x256xf32>
    %c0_8 = arith.constant 0 : index
    %c0_9 = arith.constant 0 : index
    %12 = vector.load %arg5[%c0_8, %c0_9] : memref<64x1xf32, #tpu.memory_space<vmem>>, vector<64x1xf32>
    %13 = vector.broadcast %12 : vector<64x1xf32> to vector<64x256xf32>
    %14 = arith.addf %11, %13 : vector<64x256xf32>
    %cst_10 = arith.constant 0.000000e+00 : f32
    %15 = vector.broadcast %cst_10 : f32 to vector<64x256xf32>
    %16 = arith.maximumf %14, %15 : vector<64x256xf32>
    %c0_11 = arith.constant 0 : index
    %c0_12 = arith.constant 0 : index
    %17 = vector.load %arg6[%c0_11, %c0_12] : memref<1x64xf32, #tpu.memory_space<vmem>>, vector<1x64xf32>
    %cst_13 = arith.constant dense<0.000000e+00> : vector<1x256xf32>
    %18 = tpu.matmul %17, %16, %cst_13 {dimension_numbers = #tpu.dot_dimension_numbers<[1], [0], [0], [1], [0, 0, 1, 1], [], []>} : vector<1x64xf32>, vector<64x256xf32>, vector<1x256xf32> -> vector<1x256xf32>
    %c0_14 = arith.constant 0 : index
    %c0_15 = arith.constant 0 : index
    %19 = vector.load %arg7[%c0_14, %c0_15] : memref<1x1xf32, #tpu.memory_space<vmem>>, vector<1x1xf32>
    %20 = vector.broadcast %19 : vector<1x1xf32> to vector<1x256xf32>
    %21 = arith.addf %18, %20 : vector<1x256xf32>
    %c0_16 = arith.constant 0 : index
    %c0_17 = arith.constant 0 : index
    %22 = vector.load %arg8[%c0_16, %c0_17] : memref<1x256xf32, #tpu.memory_space<vmem>>, vector<1x256xf32>
    tpu.vector_store %arg8[%c0_16, %c0_17], %21 {strides = array<i32>} : memref<1x256xf32, #tpu.memory_space<vmem>>, vector<1x256xf32>,
    return
  }
  func.func @transform_0(%arg0: i32) -> (i32, i32) {
    %c0_i32 = arith.constant 0 : i32
    %c0_i32_0 = arith.constant 0 : i32
    return %c0_i32, %arg0 : i32, i32
  }
  func.func @transform_1(%arg0: i32) -> (i32, i32) {
    %c0_i32 = arith.constant 0 : i32
    %c0_i32_0 = arith.constant 0 : i32
    %c0_i32_1 = arith.constant 0 : i32
    return %c0_i32, %c0_i32_0 : i32, i32
  }
  func.func @transform_2(%arg0: i32) -> (i32, i32) {
    %c0_i32 = arith.constant 0 : i32
    %c0_i32_0 = arith.constant 0 : i32
    %c0_i32_1 = arith.constant 0 : i32
    return %c0_i32, %c0_i32_0 : i32, i32
  }
  func.func @transform_3(%arg0: i32) -> (i32, i32) {
    %c0_i32 = arith.constant 0 : i32
    %c0_i32_0 = arith.constant 0 : i32
    %c0_i32_1 = arith.constant 0 : i32
    return %c0_i32, %c0_i32_0 : i32, i32
  }
  func.func @transform_4(%arg0: i32) -> (i32, i32) {
    %c0_i32 = arith.constant 0 : i32
    %c0_i32_0 = arith.constant 0 : i32
    %c0_i32_1 = arith.constant 0 : i32
    return %c0_i32, %c0_i32_0 : i32, i32
  }
  func.func @transform_5(%arg0: i32) -> (i32, i32) {
    %c0_i32 = arith.constant 0 : i32
    %c0_i32_0 = arith.constant 0 : i32
    %c0_i32_1 = arith.constant 0 : i32
    return %c0_i32, %c0_i32_0 : i32, i32
  }
  func.func @transform_6(%arg0: i32) -> (i32, i32) {
    %c0_i32 = arith.constant 0 : i32
    %c0_i32_0 = arith.constant 0 : i32
    %c0_i32_1 = arith.constant 0 : i32
    return %c0_i32, %c0_i32_0 : i32, i32
  }
  func.func @transform_7(%arg0: i32) -> (i32, i32) {
    %c0_i32 = arith.constant 0 : i32
    %c0_i32_0 = arith.constant 0 : i32
    return %c0_i32, %arg0 : i32, i32
  }
}

</mosaic_0001>

<bundles_post_ra>
// kernel: tpu_custom_call.1
= control target key start
LH: loop header
LB: loop body
LE: loop exit
PB: predicated region body
PF: predicated region fallthrough
CT: control target
= control target key end

     0   :  { %s689_s0 = inlined_call_operand.vmem [shape: f32[1,256], index: 0, kind: input, shape index: {}]   ;;  %s690_s1 = inlined_call_operand.vmem [shape: f32[64,1], index: 1, kind: input, shape index: {}]   ;;  %s691_s2 = inlined_call_operand.vmem [shape: f32[64,1], index: 2, kind: input, shape index: {}]   ;;  %s692_s3 = inlined_call_operand.vmem [shape: f32[64,64], index: 3, kind: input, shape index: {}]   ;;  %s693_s4 = inlined_call_operand.vmem [shape: f32[64,1], index: 4, kind: input, shape index: {}]   ;;  %s694_s5 = inlined_call_operand.vmem [shape: f32[1,64], index: 5, kind: input, shape index: {}]   ;;  %s695_s6 = inlined_call_operand.<no memory space> [shape: f32[1,1], index: 6, kind: input, shape index: {}]   ;;  %s696_s7 = inlined_call_operand.hbm [shape: f32[1,256], index: 7, kind: output, shape index: {}]  }
   0x1   :  { %v12_v0 = vstv %s695_s6 }
   0x2   :  { %13 = vst [vmem:[#allocation2] sm:$0x1] %v12_v0 }
   0x3   :  { %v105_v1 = vld [vmem:[%s691_s2 + $0x30] sm:$0xff]  ;;  %v106_v2 = vld [vmem:[%s691_s2 + $0x38] sm:$0xff]  ;;  %v501_v4 = vmov 0  }
   0x4   :  { %v37_v3 = vld [vmem:[%s690_s1 + $0x38] sm:$0xff]  ;;  %474 = vset.pattern.permute.xlu2 %v501_v4  ;;  %473 = vset.pattern.permute.xlu1 %v501_v4 }
   0x5   :  { %472 = vset.pattern.permute.xlu0 %v501_v4  ;;  %139 = vperm.xlu2 %474, %v105_v1  }
   0x6   :  { %144 = vperm.xlu1 %473, %v106_v2   ;;  %75 = vperm.xlu0 %472, %v37_v3  }
   0x7   :  { %14 = vsyncpa [#allocation4], 0  ;;  %v34_v5 = vld [vmem:[%s690_s1 + $0x20] sm:$0xff]  ;;  %v36_v6 = vld [vmem:[%s690_s1 + $0x30] sm:$0xff]  ;;  %vm235_vm0 = vcmask 523264   ;;  %s502_s16 = smov [#allocation3]  }
   0x8   :  { %v35_v7 = vld [vmem:[%s690_s1 + $0x28] sm:$0xff]  ;;  %v103_v8 = vld [vmem:[%s691_s2 + $0x20] sm:$0xff]  ;;  %v33_v10 = vld [vmem:[%s690_s1 + $0x18] sm:$0xff]  ;;  %s425_s17 = sshll.u32 %s502_s16, 4  ;;  %vm412_vm1 = vcmask 1040384   ;;  %s426_s17 = int_to_ptr.vmem [resolvable:$true] %s425_s17 }
   0x9   :  { %v104_v9 = vld [vmem:[%s691_s2 + $0x28] sm:$0xff]  ;;  %v102_v12 = vld [vmem:[%s691_s2 + $0x18] sm:$0xff]  ;;  %v32_v13 = vld [vmem:[%s690_s1 + $0x10] sm:$0xff] }
   0xa   :  { %v31_v11 = vld [vmem:[%s690_s1 + $0x8] sm:$0xff]  ;;  %v101_v15 = vld [vmem:[%s691_s2 + $0x10] sm:$0xff]  ;;  %v30_v16 = vld [vmem:[%s690_s1] sm:$0xff] }
   0xb   :  { %v100_v14 = vld [vmem:[%s691_s2 + $0x8] sm:$0xff]  ;;  %v193_v17 = vld [vmem:[%s693_s4 + $0x30] sm:$0xff]  ;;  %v99_v18 = vld [vmem:[%s691_s2] sm:$0xff] }
   0xc   :  { %v194_v19 = vld [vmem:[%s693_s4 + $0x38] sm:$0xff]  ;;  %v192_v21 = vld [vmem:[%s693_s4 + $0x28] sm:$0xff]  ;;  %v191_v22 = vld [vmem:[%s693_s4 + $0x20] sm:$0xff] }
   0xd   :  { %60 = vperm.xlu2 %474, %v34_v5   ;;  %v190_v20 = vld [vmem:[%s693_s4 + $0x18] sm:$0xff]  ;;  %v187_v23 = vld [vmem:[%s693_s4] sm:$0xff]  ;;  %v189_v24 = vld [vmem:[%s693_s4 + $0x10] sm:$0xff] }
   0xe   :  { %70 = vperm.xlu0 %472, %v36_v6   ;;  %65 = vperm.xlu1 %473, %v35_v7   ;;  %v188_v25 = vld [vmem:[%s693_s4 + $0x8] sm:$0xff]  ;;  %v359_v26 = vld [vmem:[#allocation2] sm:$0x1] }
   0xf   :  { %v29_v28 = vld [vmem:[%s689_s0] sm:$0x3] }
  0x10   :  { %v621_v29 = vperm.slane %v29_v28, 0  ;;  %v623_v30 = vperm.slane %v29_v28, 1 }
  0x15   :  { %129 = vperm.xlu2 %474, %v103_v8  }
  0x16   :  { %134 = vperm.xlu0 %472, %v104_v9   ;;  %55 = vperm.xlu1 %473, %v33_v10  }
  0x1d   :  { %45 = vperm.xlu2 %474, %v31_v11  }
  0x1e   :  { %124 = vperm.xlu1 %473, %v102_v12   ;;  %50 = vperm.xlu0 %472, %v32_v13  }
  0x25   :  { %114 = vperm.xlu2 %474, %v100_v14  }
  0x26   :  { %119 = vperm.xlu0 %472, %v101_v15   ;;  %40 = vperm.xlu1 %473, %v30_v16  }
  0x2d   :  { %227 = vperm.xlu2 %474, %v193_v17  }
  0x2e   :  { %109 = vperm.xlu0 %472, %v99_v18   ;;  %232 = vperm.xlu1 %473, %v194_v19  }
  0x35   :  { %212 = vperm.xlu2 %474, %v190_v20  }
  0x36   :  { %222 = vperm.xlu0 %472, %v192_v21   ;;  %217 = vperm.xlu1 %473, %v191_v22  }
  0x3d   :  { %197 = vperm.xlu2 %474, %v187_v23  }
  0x3e   :  { %207 = vperm.xlu0 %472, %v189_v24   ;;  %202 = vperm.xlu1 %473, %v188_v25  }
  0x46   :  { %362 = vperm.xlu0 %472, %v359_v26  }
  0x5f   :  { %v140_v27 = vpop.permute.xlu2 %139 }
  0x67   :  { %v61_v31 = vpop.permute.xlu2 %60 }
  0x68   :  { %v91_v47 = vmul.f32 %v621_v29, %v61_v31  ;;  %v92_v50 = vmul.f32 %v623_v30, %v61_v31 }
  0x6f   :  { %v130_v44 = vpop.permute.xlu2 %129 }
  0x70   :  { %v155_v55 = vadd.f32 %v130_v44, %v91_v47  ;;  %v156_v58 = vadd.f32 %v130_v44, %v92_v50 }
  0x72   :  { %v171_v62 = vmax.f32 %v155_v55, 0.0  ;;  %v172_v63 = vmax.f32 %v156_v58, 0.0 }
  0x77   :  { %v46_v61 = vpop.permute.xlu2 %45 }
  0x78   :  { %v145_v32 = vpop.permute.xlu1 %144  ;;  %v76_v33 = vpop.permute.xlu0 %75  ;;  %v85_v8 = vmul.f32 %v621_v29, %v46_v61  ;;  %v86_v9 = vmul.f32 %v623_v30, %v46_v61 }
  0x79   :  { %v97_v34 = vmul.f32 %v621_v29, %v76_v33  ;;  %v98_v35 = vmul.f32 %v623_v30, %v76_v33  ;;  %v185_v33 = vld [vmem:[%s692_s3 + $0x30] sm:$0xff] }
  0x7b   :  { %v161_v36 = vadd.f32 %v145_v32, %v97_v34  ;;  %v162_v37 = vadd.f32 %v145_v32, %v98_v35  ;;  %v179_v32 = vld [vmem:[%s692_s3] sm:$0xff]  ;;  %v181_v34 = vld [vmem:[%s692_s3 + $0x10] sm:$0xff]  ;;  %v186_v35 = vld [vmem:[%s692_s3 + $0x38] sm:$0xff] }
  0x7d   :  { %v177_v38 = vmax.f32 %v161_v36, 0.0  ;;  %v178_v39 = vmax.f32 %v162_v37, 0.0  ;;  %v182_v36 = vld [vmem:[%s692_s3 + $0x18] sm:$0xff]  ;;  %v183_v37 = vld [vmem:[%s692_s3 + $0x20] sm:$0xff] }
  0x7f   :  { %268 = vmatpush.msra.mxu0 %v177_v38  ;;  %454 = vmatpush.msra.mxu2 %v177_v38  ;;  %v115_v10 = vpop.permute.xlu2 %114 }
  0x80   :  { %309 = vmatpush.msra.mxu1 %v178_v39  ;;  %462 = vmatpush.msra.mxu3 %v178_v39  ;;  %v71_v40 = vpop.permute.xlu0 %70  ;;  %v66_v41 = vpop.permute.xlu1 %65  ;;  %v149_v14 = vadd.f32 %v115_v10, %v85_v8  ;;  %v150_v17 = vadd.f32 %v115_v10, %v86_v9 }
  0x81   :  { %v95_v42 = vmul.f32 %v621_v29, %v71_v40  ;;  %v96_v43 = vmul.f32 %v623_v30, %v71_v40  ;;  %v93_v51 = vmul.f32 %v621_v29, %v66_v41  ;;  %v94_v52 = vmul.f32 %v623_v30, %v66_v41 }
  0x82   :  { %v165_v21 = vmax.f32 %v149_v14, 0.0  ;;  %v166_v22 = vmax.f32 %v150_v17, 0.0 }
  0x83   :  { %v159_v45 = vadd.f32 %v140_v27, %v95_v42  ;;  %v160_v46 = vadd.f32 %v140_v27, %v96_v43 }
  0x85   :  { %v175_v48 = vmax.f32 %v159_v45, 0.0  ;;  %v176_v49 = vmax.f32 %v160_v46, 0.0 }
  0x87   :  { %269 = vmatpush.msra.mxu0 %v175_v48  ;;  %455 = vmatpush.msra.mxu2 %v175_v48 }
  0x88   :  { %310 = vmatpush.msra.mxu1 %v176_v49  ;;  %463 = vmatpush.msra.mxu3 %v176_v49  ;;  %v135_v53 = vpop.permute.xlu0 %134  ;;  %v56_v54 = vpop.permute.xlu1 %55 }
  0x89   :  { %v157_v56 = vadd.f32 %v135_v53, %v93_v51  ;;  %v158_v57 = vadd.f32 %v135_v53, %v94_v52  ;;  %v89_v0 = vmul.f32 %v621_v29, %v56_v54  ;;  %v90_v1 = vmul.f32 %v623_v30, %v56_v54  ;;  %v228_v49 = vpop.permute.xlu2 %227 }
  0x8b   :  { %v173_v59 = vmax.f32 %v157_v56, 0.0  ;;  %v174_v60 = vmax.f32 %v158_v57, 0.0 }
  0x8d   :  { %270 = vmatpush.msra.mxu0 %v173_v59  ;;  %456 = vmatpush.msra.mxu2 %v173_v59 }
  0x8e   :  { %311 = vmatpush.msra.mxu1 %v174_v60  ;;  %464 = vmatpush.msra.mxu3 %v174_v60 }
  0x8f   :  { %271 = vmatpush.msra.mxu0 %v171_v62  ;;  %457 = vmatpush.msra.mxu2 %v171_v62 }
  0x90   :  { %312 = vmatpush.msra.mxu1 %v172_v63  ;;  %465 = vmatpush.msra.mxu3 %v172_v63  ;;  %v125_v2 = vpop.permute.xlu1 %124  ;;  %v51_v3 = vpop.permute.xlu0 %50 }
  0x91   :  { %v153_v4 = vadd.f32 %v125_v2, %v89_v0  ;;  %v154_v5 = vadd.f32 %v125_v2, %v90_v1  ;;  %v87_v11 = vmul.f32 %v621_v29, %v51_v3  ;;  %v88_v12 = vmul.f32 %v623_v30, %v51_v3  ;;  %v213_v1 = vpop.permute.xlu2 %212 }
  0x93   :  { %v169_v6 = vmax.f32 %v153_v4, 0.0  ;;  %v170_v7 = vmax.f32 %v154_v5, 0.0 }
  0x95   :  { %272 = vmatpush.msra.mxu0 %v169_v6  ;;  %458 = vmatpush.msra.mxu2 %v169_v6 }
  0x96   :  { %313 = vmatpush.msra.mxu1 %v170_v7  ;;  %466 = vmatpush.msra.mxu3 %v170_v7 }
  0x98   :  { %v120_v13 = vpop.permute.xlu0 %119  ;;  %v41_v20 = vpop.permute.xlu1 %40 }
  0x99   :  { %v151_v15 = vadd.f32 %v120_v13, %v87_v11  ;;  %v152_v16 = vadd.f32 %v120_v13, %v88_v12  ;;  %v83_v23 = vmul.f32 %v621_v29, %v41_v20  ;;  %v84_v24 = vmul.f32 %v623_v30, %v41_v20  ;;  %v184_v29 = vld [vmem:[%s692_s3 + $0x28] sm:$0xff] }
  0x9a   :  { %v180_v30 = vld [vmem:[%s692_s3 + $0x8] sm:$0xff] }
  0x9b   :  { %v167_v18 = vmax.f32 %v151_v15, 0.0  ;;  %v168_v19 = vmax.f32 %v152_v16, 0.0 }
  0x9d   :  { %273 = vmatpush.msra.mxu0 %v167_v18  ;;  %459 = vmatpush.msra.mxu2 %v167_v18 }
  0x9e   :  { %314 = vmatpush.msra.mxu1 %v168_v19  ;;  %467 = vmatpush.msra.mxu3 %v168_v19  ;;  %v198_v19 = vpop.permute.xlu2 %197 }
  0x9f   :  { %274 = vmatpush.msra.mxu0 %v165_v21  ;;  %460 = vmatpush.msra.mxu2 %v165_v21 }
  0xa0   :  { %315 = vmatpush.msra.mxu1 %v166_v22  ;;  %468 = vmatpush.msra.mxu3 %v166_v22  ;;  %v110_v25 = vpop.permute.xlu0 %109  ;;  %v233_v46 = vpop.permute.xlu1 %232 }
  0xa1   :  { %v147_v26 = vadd.f32 %v110_v25, %v83_v23  ;;  %v148_v27 = vadd.f32 %v110_v25, %v84_v24 }
  0xa3   :  { %v163_v28 = vmax.f32 %v147_v26, 0.0  ;;  %v164_v31 = vmax.f32 %v148_v27, 0.0 }
  0xa5   :  { %275 = vmatpush.msra.mxu0 %v163_v28  ;;  %461 = vmatpush.msra.mxu2 %v163_v28 }
  0xa6   :  { %316 = vmatpush.msra.mxu1 %v164_v31  ;;  %469 = vmatpush.msra.mxu3 %v164_v31  ;;  %v358_v31 = vld [vmem:[%s694_s5] sm:$0x1]  ;;  %s427_s5 = sshll.u32 %s696_s7, 4  ;;  %s428_s5 = int_to_ptr.hbm [resolvable:$true] %s427_s5 }
  0xa7   :  { %436 = vmatmul.msk.f32.vlgmr.msra.gmra.mxu0 %vm235_vm0, %v179_v32  ;;  %441 = vmatmul.msk.f32.vlgmr.msra.gmra.mxu2 %vm235_vm0, %v184_v29 }
  0xa8   :  { %444 = vmatmul.msk.f32.vlgmr.msra.gmra.mxu1 %vm235_vm0, %v179_v32  ;;  %449 = vmatmul.msk.f32.vlgmr.msra.gmra.mxu3 %vm235_vm0, %v184_v29  ;;  %v223_v54 = vpop.permute.xlu0 %222  ;;  %v218_v61 = vpop.permute.xlu1 %217 }
  0xaf   :  { %437 = vmatmul.msk.f32.gmra.mxu0 %vm235_vm0, %v180_v30  ;;  %442 = vmatmul.msk.f32.gmra.mxu2 %vm235_vm0, %v185_v33 }
  0xb0   :  { %445 = vmatmul.msk.f32.gmra.mxu1 %vm235_vm0, %v180_v30  ;;  %450 = vmatmul.msk.f32.gmra.mxu3 %vm235_vm0, %v185_v33  ;;  %v208_v9 = vpop.permute.xlu0 %207  ;;  %v203_v14 = vpop.permute.xlu1 %202  ;;  %v415_v33 = vlaneseq }
  0xb2   :  { %vm417_vm2 = vcmp.lt.s32.totalorder %v415_v33, 256 }
  0xb7   :  { %438 = vmatmul.msk.f32.gmra.mxu0 %vm235_vm0, %v181_v34  ;;  %443 = vmatmul.msk.f32.gmra.mxu2 %vm235_vm0, %v186_v35 }
  0xb8   :  { %446 = vmatmul.msk.f32.gmra.mxu1 %vm235_vm0, %v181_v34  ;;  %451 = vmatmul.msk.f32.gmra.mxu3 %vm235_vm0, %v186_v35  ;;  %v363_v29 = vpop.permute.xlu0 %362 }
  0xb9   :  { %v365_v30 = vperm.slane %v363_v29, 0 }
  0xbf   :  { %439 = vmatmul.msk.f32.gmra.mxu0 %vm235_vm0, %v182_v36 }
  0xc0   :  { %447 = vmatmul.msk.f32.gmra.mxu1 %vm235_vm0, %v182_v36 }
  0xc7   :  { %440 = vmatmul.msk.f32.gmra.mxu0 %vm235_vm0, %v183_v37 }
  0xc8   :  { %448 = vmatmul.msk.f32.gmra.mxu1 %vm235_vm0, %v183_v37 }
 0x124   :  { %v277_v38 = vpop.f32.mrf.mxu0 }
 0x125   :  { %v318_v39 = vpop.f32.mrf.mxu1  ;;  %v278_v22 = vadd.f32 %v277_v38, %v198_v19 }
 0x126   :  { %v319_v24 = vadd.f32 %v318_v39, %v198_v19 }
 0x127   :  { %v342_v28 = vmax.f32 %v278_v22, 0.0 }
 0x128   :  { %v343_v32 = vmax.f32 %v319_v24, 0.0 }
 0x12a   :  { %v292_v40 = vpop.f32.mrf.mxu2 }
 0x12b   :  { %v333_v41 = vpop.f32.mrf.mxu3  ;;  %v293_v58 = vadd.f32 %v292_v40, %v223_v54 }
 0x12c   :  { %v280_v42 = vpop.f32.mrf.mxu0  ;;  %v334_v62 = vadd.f32 %v333_v41, %v223_v54 }
 0x12d   :  { %v321_v43 = vpop.f32.mrf.mxu1  ;;  %v352_v3 = vmax.f32 %v293_v58, 0.0  ;;  %v281_v17 = vadd.f32 %v280_v42, %v203_v14 }
 0x12e   :  { %v353_v4 = vmax.f32 %v334_v62, 0.0  ;;  %v322_v20 = vadd.f32 %v321_v43, %v203_v14 }
 0x12f   :  { %v344_v26 = vmax.f32 %v281_v17, 0.0 }
 0x130   :  { %v345_v27 = vmax.f32 %v322_v20, 0.0 }
 0x132   :  { %v295_v44 = vpop.f32.mrf.mxu2 }
 0x133   :  { %v336_v45 = vpop.f32.mrf.mxu3  ;;  %v296_v51 = vadd.f32 %v295_v44, %v228_v49 }
 0x134   :  { %v283_v47 = vpop.f32.mrf.mxu0  ;;  %v337_v55 = vadd.f32 %v336_v45, %v228_v49 }
 0x135   :  { %v324_v48 = vpop.f32.mrf.mxu1  ;;  %v354_v0 = vmax.f32 %v296_v51, 0.0  ;;  %v284_v12 = vadd.f32 %v283_v47, %v208_v9 }
 0x136   :  { %v355_v2 = vmax.f32 %v337_v55, 0.0  ;;  %v325_v15 = vadd.f32 %v324_v48, %v208_v9 }
 0x137   :  { %v346_v23 = vmax.f32 %v284_v12, 0.0 }
 0x138   :  { %v347_v25 = vmax.f32 %v325_v15, 0.0 }
 0x13a   :  { %v298_v50 = vpop.f32.mrf.mxu2 }
 0x13b   :  { %v299_v52 = vadd.f32 %v298_v50, %v233_v46  ;;  %v339_v53 = vpop.f32.mrf.mxu3 }
 0x13c   :  { %v340_v56 = vadd.f32 %v339_v53, %v233_v46  ;;  %v286_v57 = vpop.f32.mrf.mxu0 }
 0x13d   :  { %v356_v59 = vmax.f32 %v299_v52, 0.0  ;;  %v327_v60 = vpop.f32.mrf.mxu1  ;;  %v287_v6 = vadd.f32 %v286_v57, %v213_v1 }
 0x13e   :  { %v357_v63 = vmax.f32 %v340_v56, 0.0  ;;  %v328_v10 = vadd.f32 %v327_v60, %v213_v1 }
 0x13f   :  { %377 = vmatpush.msrb.mxu2 %v356_v59  ;;  %v348_v18 = vmax.f32 %v287_v6, 0.0 }
 0x140   :  { %397 = vmatpush.msrb.mxu3 %v357_v63  ;;  %v349_v21 = vmax.f32 %v328_v10, 0.0 }
 0x141   :  { %378 = vmatpush.msrb.mxu2 %v354_v0 }
 0x142   :  { %398 = vmatpush.msrb.mxu3 %v355_v2 }
 0x143   :  { %379 = vmatpush.msrb.mxu2 %v352_v3 }
 0x144   :  { %399 = vmatpush.msrb.mxu3 %v353_v4  ;;  %v289_v5 = vpop.f32.mrf.mxu0 }
 0x145   :  { %v290_v7 = vadd.f32 %v289_v5, %v218_v61  ;;  %v330_v8 = vpop.f32.mrf.mxu1 }
 0x146   :  { %v331_v11 = vadd.f32 %v330_v8, %v218_v61 }
 0x147   :  { %v350_v13 = vmax.f32 %v290_v7, 0.0 }
 0x148   :  { %v351_v16 = vmax.f32 %v331_v11, 0.0 }
 0x149   :  { %380 = vmatpush.msrb.mxu2 %v350_v13 }
 0x14a   :  { %400 = vmatpush.msrb.mxu3 %v351_v16 }
 0x14b   :  { %381 = vmatpush.msrb.mxu2 %v348_v18 }
 0x14c   :  { %401 = vmatpush.msrb.mxu3 %v349_v21 }
 0x14d   :  { %382 = vmatpush.msrb.mxu2 %v346_v23 }
 0x14e   :  { %402 = vmatpush.msrb.mxu3 %v347_v25 }
 0x14f   :  { %383 = vmatpush.msrb.mxu2 %v344_v26 }
 0x150   :  { %403 = vmatpush.msrb.mxu3 %v345_v27 }
 0x151   :  { %384 = vmatpush.msrb.mxu2 %v342_v28 }
 0x152   :  { %404 = vmatpush.msrb.mxu3 %v343_v32  ;;  %452 = vmatmul.msk.f32.vlgmr.msrb.gmra.mxu2 %vm235_vm0, %v358_v31 }
 0x153   :  { %453 = vmatmul.msk.f32.vlgmr.msrb.gmra.mxu3 %vm235_vm0, %v358_v31 }
 0x1d5   :  { %v386_v34 = vpop.f32.mrf.mxu2 }
 0x1d6   :  { %v406_v35 = vpop.f32.mrf.mxu3  ;;  %v387_v37 = vadd.f32 %v386_v34, %v365_v30 }
 0x1d7   :  { %v407_v36 = vadd.f32 %v406_v35, %v365_v30 }
 0x1d9   :  { %v411_v38 = vrot.slane %v407_v36, 7 }
 0x1db   :  { %v413_v39 = vsel %vm412_vm1, %v387_v37, %v411_v38 }
 0x1dc   :  { %419 = vst.msk [vmem:[#allocation3] sm:$0x3] %vm417_vm2, %v413_v39 }
 0x1dd   :  { %430 = dma.vmem_to_hbm [thread:$0]  %s426_s17, 32, %s428_s5, [#allocation4]  }
 0x1de   :  { %499 = dma.done.wait [#allocation4], 32  }
 0x1df   :  { %500 = vsyncadd [#allocation4], 4294967264 }
 0x1e0   :  { %435 = vsyncpa [#allocation4], 1 }

</bundles_post_ra>
